<compile_context>
chip_gen: v6e
topology: v6e:2x2x1
jax: 0.10.0
libtpu: 0.0.40
codegen_flags: <defaults>
</compile_context>

<pallas_src>
import jax
import jax.numpy as jnp
from jax.experimental import pallas as pl
from jax.experimental.pallas import tpu as pltpu


# ----------------------------- kernel ---------------------------------------

def _add_bias_kernel(x_ref, b_ref, o_ref):
    # b_ref is either (1, TN) (broadcast over sublanes, free) or (TM, 1)
    # (broadcast over lanes); either way the add is a pure VPU op hidden
    # under the HBM DMAs.
    o_ref[...] = x_ref[...] + b_ref[...]


# ----------------------------- tiling ---------------------------------------

# Payload (x-block + out-block + bias-block) per pipeline stage. Double
# buffering doubles it, so total buffering stays ~32 MiB < the 48 MiB limit.
_SET_BYTES = 16 * 1024 * 1024
_VMEM_LIMIT_BYTES = 48 * 1024 * 1024


def _sublane_multiple(dtype) -> int:
    # f32 -> 8, bf16 -> 16, int8/fp8 -> 32 (sub-32-bit packs along sublanes).
    return max(8, 32 // jnp.dtype(dtype).itemsize)


def _pick_tiles(M, N, dtype, bias_kind):
    """Pick (TM, TN) for a 2-D elementwise add of shape (M, N).

    bias_kind: "row" -> bias block (1, TN) (padded to `sub` sublanes in VMEM)
               "col" -> bias block (TM, 1) (padded to 128 lanes in VMEM)
    """
    sub = _sublane_multiple(dtype)
    set_elems = max(3 * sub * 128, _SET_BYTES // jnp.dtype(dtype).itemsize)

    def bias_elems(tm, tn):
        return sub * tn if bias_kind == "row" else tm * 128

    # Lane tile: keep the full (contiguous) extent whenever one sublane-group
    # of rows fits the budget; otherwise split on large multiples of 128.
    if N <= 128 or 2 * sub * N + bias_elems(sub, N) <= set_elems:
        tn = N
    else:
        if bias_kind == "row":
            cap = set_elems // (3 * sub)
        else:
            cap = (set_elems - sub * 128) // (2 * sub)
        tn = max(128, min(N, (cap // 128) * 128))

    # Sublane tile from the remaining budget (dtype-aware rounding).
    if bias_kind == "row":
        rows_cap = max(sub, (set_elems - sub * tn) // (2 * tn))
    else:
        rows_cap = max(sub, set_elems // (2 * tn + 128))
    tm = M if M <= rows_cap else max(sub, (rows_cap // sub) * sub)
    return tm, tn


def _launch_add_bias(x, b, bias_kind):
    """x: (M, N); b: (1, N) if bias_kind == 'row' else (M, 1)."""
    M, N = x.shape
    tm, tn = _pick_tiles(M, N, x.dtype, bias_kind)
    gm, gn = pl.cdiv(M, tm), pl.cdiv(N, tn)
    bias_block = (1, tn) if bias_kind == "row" else (tm, 1)

    # Lead with the larger grid axis so v7x's two TensorCores both get work.
    if gn > gm:
        grid = (gn, gm)
        x_map = lambda j, i: (i, j)
        b_map = (lambda j, i: (0, j)) if bias_kind == "row" else (lambda j, i: (i, 0))
    else:
        grid = (gm, gn)
        x_map = lambda i, j: (i, j)
        b_map = (lambda i, j: (0, j)) if bias_kind == "row" else (lambda i, j: (i, 0))

    return pl.pallas_call(
        _add_bias_kernel,
        out_shape=jax.ShapeDtypeStruct((M, N), x.dtype),
        grid=grid,
        in_specs=[
            pl.BlockSpec((tm, tn), x_map),
            pl.BlockSpec(bias_block, b_map),
        ],
        out_specs=pl.BlockSpec((tm, tn), x_map),
        compiler_params=pltpu.CompilerParams(
            dimension_semantics=("parallel", "parallel"),
            vmem_limit_bytes=_VMEM_LIMIT_BYTES),
    )(x, b)


# ----------------------------- wrapper --------------------------------------

def add_bias(x: jax.Array, bias: jax.Array) -> jax.Array:
    """Pallas equivalent of AddBias.forward.

    Args:
      x:    (B, C) or (N, C, H, W)
      bias: (C, 1)  -- same shape as the PyTorch nn.Parameter
    """
    assert bias.ndim == 2 and bias.shape[1] == 1
    C = bias.shape[0]
    bias = bias.astype(x.dtype)

    if x.ndim == 2:
        B, Cx = x.shape
        assert Cx == C
        bias_row = bias.reshape(1, C)  # relayout once, outside the kernel

        if C < 128:
            # Fold g rows into the lane axis so the last dim is >= ~128 wide:
            # unmasked lane-dense stores instead of masked partial vst.
            g = max(1, 128 // C)
            B_pad = pl.cdiv(B, g) * g
            xp = x if B_pad == B else jnp.pad(x, ((0, B_pad - B), (0, 0)))
            xf = xp.reshape(B_pad // g, g * C)          # contiguous reshape
            bias_f = jnp.tile(bias_row, (1, g))         # (1, g*C), built once
            yf = _launch_add_bias(xf, bias_f, "row")
            y = yf.reshape(B_pad, C)
            return y if B_pad == B else y[:B]

        return _launch_add_bias(x, bias_row, "row")

    elif x.ndim == 4:
        N_, Cx, H, W = x.shape
        assert Cx == C
        L = H * W
        # Collapse (N, C) onto the sublane axis and (H, W) onto the lane axis:
        # full sublane occupancy for any C (even C < 8), one fewer grid axis,
        # lane-dense last dim. Bias becomes a per-row column, tiled once.
        x2 = x.reshape(N_ * C, L)                        # contiguous reshape
        bias_col = jnp.tile(bias, (N_, 1))               # (N*C, 1)
        y2 = _launch_add_bias(x2, bias_col, "col")
        return y2.reshape(N_, C, H, W)

    else:
        raise ValueError(f"AddBias supports 2-D or 4-D inputs, got ndim={x.ndim}")


# ------------------------------ demo ----------------------------------------

if __name__ == "__main__":
    key = jax.random.PRNGKey(0)
    k_bias, k_x4, k_x2, k_xw = jax.random.split(key, 4)

    C = 4
    # Deterministic parameter (matches nn.Parameter(bias.unsqueeze(1)) shape).
    bias_param = jax.random.normal(k_bias, (C, 1), dtype=jnp.float32)

    # 4-D case: NCHW input.
    x4 = jax.random.normal(k_x4, (2, C, 16, 16), dtype=jnp.float32)
    y4 = jax.block_until_ready(add_bias(x4, bias_param))
    ref4 = x4 + bias_param.reshape(1, C, 1, 1)
    assert y4.shape == ref4.shape
    assert jnp.allclose(y4, ref4, atol=1e-6), "4D mismatch"

    # 2-D case (small C -> row-folding path).
    x2 = jax.random.normal(k_x2, (8, C), dtype=jnp.float32)
    y2 = jax.block_until_ready(add_bias(x2, bias_param))
    ref2 = x2 + bias_param.reshape(1, C)
    assert y2.shape == ref2.shape
    assert jnp.allclose(y2, ref2, atol=1e-6), "2D mismatch"

    # 2-D case with wide features (no folding path).
    Cw = 256
    bias_w = jax.random.normal(k_bias, (Cw, 1), dtype=jnp.float32)
    xw = jax.random.normal(k_xw, (16, Cw), dtype=jnp.float32)
    yw = jax.block_until_ready(add_bias(xw, bias_w))
    refw = xw + bias_w.reshape(1, Cw)
    assert jnp.allclose(yw, refw, atol=1e-6), "2D-wide mismatch"

    print("KERNEL_OK")
</pallas_src>

<mosaic_0001>
module attributes {stable_mosaic.version = 11 : i64} {
  func.func @_add_bias_kernel(%arg0: i32, %arg1: i32, %arg2: memref<8x256xf32, #tpu.memory_space<vmem>>, %arg3: memref<8x1xf32, #tpu.memory_space<vmem>>, %arg4: memref<8x256xf32, #tpu.memory_space<vmem>>) attributes {dimension_semantics = [#tpu.dimension_semantics<parallel>, #tpu.dimension_semantics<parallel>], iteration_bounds = array<i64: 1, 1>, scalar_prefetch = 0 : i64, scratch_operands = 0 : i64, tpu.core_type = #tpu.core_type<tc>, window_params = [{transform_indices = @transform_0, window_bounds = array<i64: 8, 256>}, {transform_indices = @transform_1, window_bounds = array<i64: 8, 1>}, {transform_indices = @transform_2, window_bounds = array<i64: 8, 256>}]} {
    %c0 = arith.constant 0 : index
    %c0_0 = arith.constant 0 : index
    %0 = vector.load %arg2[%c0, %c0_0] : memref<8x256xf32, #tpu.memory_space<vmem>>, vector<8x256xf32>
    %c0_1 = arith.constant 0 : index
    %c0_2 = arith.constant 0 : index
    %1 = vector.load %arg3[%c0_1, %c0_2] : memref<8x1xf32, #tpu.memory_space<vmem>>, vector<8x1xf32>
    %2 = vector.broadcast %1 : vector<8x1xf32> to vector<8x256xf32>
    %3 = arith.addf %0, %2 : vector<8x256xf32>
    %c0_3 = arith.constant 0 : index
    %c0_4 = arith.constant 0 : index
    %4 = vector.load %arg4[%c0_3, %c0_4] : memref<8x256xf32, #tpu.memory_space<vmem>>, vector<8x256xf32>
    tpu.vector_store %arg4[%c0_3, %c0_4], %3 {strides = array<i32>} : memref<8x256xf32, #tpu.memory_space<vmem>>, vector<8x256xf32>,
    return
  }
  func.func @transform_0(%arg0: i32, %arg1: i32) -> (i32, i32) {
    %c0_i32 = arith.constant 0 : i32
    return %arg0, %arg1 : i32, i32
  }
  func.func @transform_1(%arg0: i32, %arg1: i32) -> (i32, i32) {
    %c0_i32 = arith.constant 0 : i32
    %c0_i32_0 = arith.constant 0 : i32
    return %arg0, %c0_i32 : i32, i32
  }
  func.func @transform_2(%arg0: i32, %arg1: i32) -> (i32, i32) {
    %c0_i32 = arith.constant 0 : i32
    return %arg0, %arg1 : i32, i32
  }
}

</mosaic_0001>

<bundles_post_ra>
// kernel: tpu_custom_call.1
= control target key start
LH: loop header
LB: loop body
LE: loop exit
PB: predicated region body
PF: predicated region fallthrough
CT: control target
= control target key end

     0   :  { %7 = vsyncpa [#allocation3], 0  ;;  %s126_s0 = inlined_call_operand.hbm [shape: f32[8,256], index: 0, kind: input, shape index: {}]   ;;  %s127_s1 = inlined_call_operand.vmem [shape: f32[8,1], index: 1, kind: input, shape index: {}]   ;;  %s128_s2 = inlined_call_operand.hbm [shape: f32[8,256], index: 2, kind: output, shape index: {}]  }
   0x1   :  { %8 = vsyncpa [#allocation4], 0  ;;  %s99_s9 = smov [#allocation2]  }
   0x2   :  { %s15_s10 = sshll.u32 %s99_s9, 4  ;;  %s16_s10 = int_to_ptr.vmem [resolvable:$true] %s15_s10 }
   0x3   :  { %s63_s11 = scalar_lea.vmem %s16_s10, 256  ;;  %p68_p1 = scmp.lt.s32.totalorder %s16_s10, %s16_s10 }
   0x4   :  { %p64_p0 = scmp.ne.s32.totalorder %s16_s10, %s63_s11  ;;  %p69_p2 = scmp.lt.s32.totalorder %s63_s11, %s63_s11 }
   0x6   :  { %p70_p3 = por %p69_p2, %p68_p1 }
   0x8   :  { %p71_p4 = pnand %p70_p3, %p64_p0 }
   0xa   :  { %74 = shalt.err (!%p71_p4)
}
   0xb   :  { %18 = dma.hbm_to_vmem [thread:$0]  %s126_s0, 256, %s16_s10, [#allocation3]  }
   0xc   :  { %95 = dma.done.wait [#allocation3], 256  }
   0xd   :  { %96 = vsyncadd [#allocation3], 4294967040  ;;  %v100_v0 = vmov 0   ;;  %v26_v1 = vld [vmem:[%s127_s1] sm:$0xff]  ;;  %v25_v3 = vld [vmem:[#allocation2 + $0x8] sm:$0xff]  ;;  %s101_s16 = smov [#allocation5]  }
   0xe   :  { %54 = vset.pattern.permute.xlu0 %v100_v0  ;;  %v24_v2 = vld [vmem:[#allocation2] sm:$0xff]  ;;  %s42_s17 = sshll.u32 %s101_s16, 4  ;;  %s43_s17 = int_to_ptr.vmem [resolvable:$true] %s42_s17 }
   0xf   :  { %29 = vperm.xlu0 %54, %v26_v1   ;;  %s75_s0 = scalar_lea.vmem %s43_s17, 256  ;;  %p80_p6 = scmp.lt.s32.totalorder %s43_s17, %s43_s17 }
  0x10   :  { %p76_p5 = scmp.ne.s32.totalorder %s43_s17, %s75_s0  ;;  %p81_p7 = scmp.lt.s32.totalorder %s75_s0, %s75_s0 }
  0x12   :  { %p82_p8 = por %p81_p7, %p80_p6 }
  0x14   :  { %p83_p9 = pnand %p82_p8, %p76_p5 }
  0x8a   :  { %v30_v4 = vpop.permute.xlu0 %29 }
  0x8b   :  { %v32_v5 = vadd.f32 %v30_v4, %v24_v2  ;;  %v33_v6 = vadd.f32 %v30_v4, %v25_v3 }
  0x8d   :  { %34 = vst [vmem:[#allocation5] sm:$0xff] %v32_v5  ;;  %35 = vst [vmem:[#allocation5 + $0x8] sm:$0xff] %v33_v6 }
  0x8e   :  { %86 = shalt.err (!%p83_p9)
}
  0x8f   :  { %45 = dma.vmem_to_hbm [thread:$0]  %s43_s17, 256, %s128_s2, [#allocation4]  }
  0x90   :  { %97 = dma.done.wait [#allocation4], 256  }
  0x91   :  { %98 = vsyncadd [#allocation4], 4294967040 }
  0x92   :  { %49 = vsyncpa [#allocation3], 1 }
  0x93   :  { %50 = vsyncpa [#allocation4], 1 }

</bundles_post_ra>
